<compile_context>
chip_gen: v6e
topology: v6e:2x2x1
jax: 0.10.0
libtpu: 0.0.40
codegen_flags: <defaults>
</compile_context>

<pallas_src>
import functools

import jax
import jax.numpy as jnp
from jax.experimental import pallas as pl
from jax.experimental.pallas import tpu as pltpu


def _round_up(x, m):
    return ((x + m - 1) // m) * m


def _f32(x):
    return x.astype(jnp.float32)


def _yolo_loss_kernel(pred_ref, tgt_ref, out_ref, acc_ref, *,
                      l_coord, l_noobj, inv_iou_s):
    """Processes one (30, rows_blk, 128) tile of grid cells.

    pred_ref / tgt_ref : (30, rows_blk, 128) VMEM tiles (native input dtype);
                         channels on the leading (batch) axis, cells dense on
                         the (sublane, lane) axes.
    out_ref            : (8, 128) f32, written once on the last block.
    acc_ref            : (rows_blk, 128) f32 per-cell loss accumulator.
    """
    blk = pl.program_id(0)
    n_blk = pl.num_programs(0)

    @pl.when(blk == 0)
    def _init():
        acc_ref[...] = jnp.zeros_like(acc_ref)

    r, lanes = acc_ref.shape

    # ---------------- masks --------------------------------------------------
    conf_t = _f32(tgt_ref[4])                       # (r, 128) target conf box-0
    obj_b = conf_t > 0.0                            # cells containing an object
    obj_f = obj_b.astype(jnp.float32)
    noobj_f = (conf_t == 0.0).astype(jnp.float32)

    # ---------------- no-object loss (confidence channels 4 and 9) -----------
    d4 = _f32(pred_ref[4]) - conf_t
    d9 = _f32(pred_ref[9]) - _f32(tgt_ref[9])
    noobj_term = d4 * d4 + d9 * d9

    # ---------------- class prediction loss (channels 10:30) -----------------
    dc = _f32(pred_ref[10:30]) - _f32(tgt_ref[10:30])
    class_term = jnp.sum(dc * dc, axis=0)           # (r, 128)

    # ---------------- best-IoU responsible box -------------------------------
    # NOTE: the reference hardcodes S = 14.0 inside find_best_iou_boxes,
    # independent of self.S -- reproduced via inv_iou_s = 1/14.
    def corners(box):                                # box: (5, r, 128)
        cx = box[0] * inv_iou_s
        cy = box[1] * inv_iou_s
        hw = 0.5 * box[2]
        hh = 0.5 * box[3]
        return cx - hw, cy - hh, cx + hw, cy + hh

    tbox0 = _f32(tgt_ref[0:5])
    tx1, ty1, tx2, ty2 = corners(tbox0)              # hoisted: shared by both IoUs
    area_t = (tx2 - tx1) * (ty2 - ty1)

    def iou_vs_target(pbox):
        px1, py1, px2, py2 = corners(pbox)
        iw = jnp.maximum(jnp.minimum(px2, tx2) - jnp.maximum(px1, tx1), 0.0)
        ih = jnp.maximum(jnp.minimum(py2, ty2) - jnp.maximum(py1, ty1), 0.0)
        inter = iw * ih
        area_p = (px2 - px1) * (py2 - py1)
        union = area_p + area_t - inter
        # Exact division kept (not approx reciprocal): the IoU feeds a discrete
        # box-selection compare; the guard keeps padded / degenerate lanes at 0
        # so masked-out cells cannot inject NaN into the accumulator.
        union = jnp.where(union > 0.0, union, 1.0)
        return inter / union

    iou0 = iou_vs_target(_f32(pred_ref[0:5]))
    iou1 = iou_vs_target(_f32(pred_ref[5:10]))
    sel1 = iou1 > iou0                 # strict: matches torch.max tie-break
    iou_max = jnp.where(sel1, iou1, iou0)

    # ---------------- containing-object confidence loss ----------------------
    p_conf = jnp.where(sel1, _f32(pred_ref[9]), _f32(pred_ref[4]))
    dcnf = p_conf - iou_max
    contain_term = dcnf * dcnf

    # ---------------- regression loss (xy + sqrt-wh) -------------------------
    sel1_2 = jnp.broadcast_to(sel1, (2, r, lanes))   # broadcast hoisted once
    dxy = (jnp.where(sel1_2, _f32(pred_ref[5:7]), _f32(pred_ref[0:2]))
           - jnp.where(sel1_2, _f32(tgt_ref[5:7]), _f32(tgt_ref[0:2])))
    reg_xy = jnp.sum(dxy * dxy, axis=0)

    obj_2 = jnp.broadcast_to(obj_b, (2, r, lanes))   # sqrt guard for masked lanes
    pw = jnp.where(obj_2,
                   jnp.where(sel1_2, _f32(pred_ref[7:9]), _f32(pred_ref[2:4])),
                   1.0)
    tw = jnp.where(obj_2,
                   jnp.where(sel1_2, _f32(tgt_ref[7:9]), _f32(tgt_ref[2:4])),
                   1.0)
    dwh = jnp.sqrt(pw) - jnp.sqrt(tw)
    reg_wh = jnp.sum(dwh * dwh, axis=0)

    # ------- fold loss weights + masks into one dense per-cell partial -------
    cell_loss = (l_noobj * (noobj_f * noobj_term)
                 + obj_f * (class_term + contain_term
                            + l_coord * (reg_xy + reg_wh)))
    acc_ref[...] += cell_loss

    # Single deferred cross-lane/sublane reduction, once at the end.
    @pl.when(blk == n_blk - 1)
    def _finalize():
        out_ref[...] = jnp.broadcast_to(jnp.sum(acc_ref[...]), (8, 128))


def yolo_loss(pred_tensor, target_tensor, *, l_coord=5.0, l_noobj=0.5,
              block_cells=16384):
    """pred_tensor, target_tensor: (N, S, S, 30). Returns the scalar loss."""
    N, S1, S2, ch = pred_tensor.shape
    assert ch == 30
    C = N * S1 * S2

    # Cells are packed 128 per lane-row; blocks of rows_blk rows (multiple of
    # 8 sublanes) tile the row axis; padded cells are all-zero and contribute
    # exactly 0 to every loss term.
    R = pl.cdiv(C, 128)
    rows_blk = max(8, min(block_cells // 128, _round_up(R, 8)))
    rows_blk = _round_up(rows_blk, 8)
    R_pad = _round_up(R, rows_blk)
    C_pad = R_pad * 128
    n_blocks = R_pad // rows_blk

    def to_kernel_layout(x):
        # One relayout pass: (N,S,S,30) -> (C,30) view -> pad -> (30,R_pad,128).
        # Native dtype is preserved (no astype here); the kernel upcasts
        # per-slice, so bf16 inputs halve the kernel's HBM read bytes.
        x = x.reshape(C, 30)
        if C_pad != C:
            x = jnp.pad(x, ((0, C_pad - C), (0, 0)))
        return jnp.transpose(x).reshape(30, R_pad, 128)

    pred_t = to_kernel_layout(pred_tensor)
    tgt_t = to_kernel_layout(target_tensor)

    kernel = functools.partial(
        _yolo_loss_kernel,
        l_coord=float(l_coord),
        l_noobj=float(l_noobj),
        inv_iou_s=1.0 / 14.0,  # the reference hardcodes S=14.0 in find_best_iou_boxes
    )

    itemsize = jnp.dtype(pred_t.dtype).itemsize
    in_spec = pl.BlockSpec((30, rows_blk, 128), lambda i: (0, i, 0))
    out = pl.pallas_call(
        kernel,
        grid=(n_blocks,),
        in_specs=[in_spec, in_spec],
        out_specs=pl.BlockSpec((8, 128), lambda i: (0, 0)),
        out_shape=jax.ShapeDtypeStruct((8, 128), jnp.float32),
        scratch_shapes=[pltpu.VMEM((rows_blk, 128), jnp.float32)],
        compiler_params=pltpu.CompilerParams(
            dimension_semantics=("arbitrary",),
            vmem_limit_bytes=32 * 1024 * 1024),
        cost_estimate=pl.CostEstimate(
            flops=250 * C_pad,
            transcendentals=4 * C_pad,
            bytes_accessed=2 * 30 * C_pad * itemsize),
    )(pred_t, tgt_t)

    # The reference's final division by the batch size.
    return out[0, 0] / float(N)


# --------------------------- pure-JAX reference ------------------------------
def _yolo_loss_ref(pred, tgt, l_coord=5.0, l_noobj=0.5):
    N = pred.shape[0]
    p = pred.reshape(-1, 30).astype(jnp.float32)
    t = tgt.reshape(-1, 30).astype(jnp.float32)
    obj = t[:, 4] > 0
    noobj = t[:, 4] == 0
    no_object_loss = jnp.sum(jnp.where(
        noobj, (p[:, 4] - t[:, 4]) ** 2 + (p[:, 9] - t[:, 9]) ** 2, 0.0))
    class_loss = jnp.sum(jnp.where(obj[:, None],
                                   (p[:, 10:] - t[:, 10:]) ** 2, 0.0))
    S = 14.0

    def corners(b):
        cx, cy = b[:, 0] / S, b[:, 1] / S
        hw, hh = 0.5 * b[:, 2], 0.5 * b[:, 3]
        return cx - hw, cy - hh, cx + hw, cy + hh

    def iou(a, b):
        ax1, ay1, ax2, ay2 = corners(a)
        bx1, by1, bx2, by2 = corners(b)
        iw = jnp.maximum(jnp.minimum(ax2, bx2) - jnp.maximum(ax1, bx1), 0.0)
        ih = jnp.maximum(jnp.minimum(ay2, by2) - jnp.maximum(ay1, by1), 0.0)
        inter = iw * ih
        area_a = (ax2 - ax1) * (ay2 - ay1)
        area_b = (bx2 - bx1) * (by2 - by1)
        union = area_a + area_b - inter
        return inter / jnp.where(union > 0, union, 1.0)

    pb0, pb1, tb0, tb1 = p[:, 0:5], p[:, 5:10], t[:, 0:5], t[:, 5:10]
    i0, i1 = iou(pb0, tb0), iou(pb1, tb0)
    sel1 = i1 > i0
    imax = jnp.where(sel1, i1, i0)
    psel = jnp.where(sel1[:, None], pb1, pb0)
    tsel = jnp.where(sel1[:, None], tb1, tb0)
    contain = jnp.sum(jnp.where(obj, (psel[:, 4] - imax) ** 2, 0.0))
    reg_xy = jnp.sum(jnp.where(obj[:, None],
                               (psel[:, :2] - tsel[:, :2]) ** 2, 0.0))
    pw = jnp.where(obj[:, None], psel[:, 2:4], 1.0)
    tw = jnp.where(obj[:, None], tsel[:, 2:4], 1.0)
    reg_wh = jnp.sum(jnp.where(obj[:, None],
                               (jnp.sqrt(pw) - jnp.sqrt(tw)) ** 2, 0.0))
    total = (l_coord * (reg_xy + reg_wh) + contain
             + l_noobj * no_object_loss + class_loss)
    return total / N


if __name__ == "__main__":
    key = jax.random.PRNGKey(0)
    N, S = 2, 14  # module's S; B=2 boxes is implied by the 30-channel layout

    kp, kt, kc = jax.random.split(key, 3)
    # Predicted tensor: positive values so sqrt(w), sqrt(h) are well defined
    # (matches the assumptions of the PyTorch reference, which would NaN
    # otherwise).
    pred = jax.random.uniform(kp, (N, S, S, 30), jnp.float32, 0.05, 0.95)
    # Target tensor: positive box coords/sizes and classes.
    tgt = jax.random.uniform(kt, (N, S, S, 30), jnp.float32, 0.10, 0.90)
    # Object indicator lives in channel 4: exactly 1.0 for object cells,
    # exactly 0.0 for empty cells.
    has_obj = jax.random.bernoulli(kc, 0.3, (N, S, S)).astype(jnp.float32)
    tgt = tgt.at[..., 4].set(has_obj)

    loss = yolo_loss(pred, tgt, l_coord=5.0, l_noobj=0.5)
    loss = jax.block_until_ready(loss)

    ref = jax.block_until_ready(_yolo_loss_ref(pred, tgt, 5.0, 0.5))
    assert jnp.allclose(loss, ref, rtol=1e-3, atol=1e-3), (float(loss), float(ref))

    print("KERNEL_OK")
</pallas_src>

<mosaic_0001>
module attributes {stable_mosaic.version = 11 : i64} {
  func.func @_yolo_loss_kernel(%arg0: i32, %arg1: memref<30x8x128xf32, #tpu.memory_space<vmem>>, %arg2: memref<30x8x128xf32, #tpu.memory_space<vmem>>, %arg3: memref<8x128xf32, #tpu.memory_space<vmem>>, %arg4: memref<8x128xf32, #tpu.memory_space<vmem>>) attributes {dimension_semantics = [#tpu.dimension_semantics<arbitrary>], iteration_bounds = array<i64: 1>, scalar_prefetch = 0 : i64, scratch_operands = 1 : i64, tpu.core_type = #tpu.core_type<tc>, window_params = [{transform_indices = @transform_0, window_bounds = array<i64: 30, 8, 128>}, {transform_indices = @transform_1, window_bounds = array<i64: 30, 8, 128>}, {pipeline_mode = #tpu.pipeline_mode<synchronous>, transform_indices = @transform_2, window_bounds = array<i64: 8, 128>}]} {
    %c0_i32 = arith.constant 0 : i32
    %0 = arith.cmpi eq, %arg0, %c0_i32 : i32
    %1 = arith.extui %0 : i1 to i32
    %c0_i32_0 = arith.constant 0 : i32
    %2 = arith.cmpi ne, %1, %c0_i32_0 : i32
    scf.if %2 {
      %cst_85 = arith.constant 0.000000e+00 : f32
      %190 = vector.broadcast %cst_85 : f32 to vector<8x128xf32>
      %c0_86 = arith.constant 0 : index
      %c0_87 = arith.constant 0 : index
      %191 = vector.load %arg4[%c0_86, %c0_87] : memref<8x128xf32, #tpu.memory_space<vmem>>, vector<8x128xf32>
      tpu.vector_store %arg4[%c0_86, %c0_87], %190 {strides = array<i32>} : memref<8x128xf32, #tpu.memory_space<vmem>>, vector<8x128xf32>,
    } else {
    }
    %c4 = arith.constant 4 : index
    %c0 = arith.constant 0 : index
    %c0_1 = arith.constant 0 : index
    %3 = vector.load %arg2[%c4, %c0, %c0_1] : memref<30x8x128xf32, #tpu.memory_space<vmem>>, vector<1x8x128xf32>
    %4 = vector.shape_cast %3 : vector<1x8x128xf32> to vector<8x128xf32>
    %cst = arith.constant 0.000000e+00 : f32
    %5 = vector.broadcast %cst : f32 to vector<8x128xf32>
    %6 = arith.cmpf ogt, %4, %5 : vector<8x128xf32>
    %7 = arith.extui %6 : vector<8x128xi1> to vector<8x128xi32>
    %8 = arith.sitofp %7 : vector<8x128xi32> to vector<8x128xf32>
    %cst_2 = arith.constant 0.000000e+00 : f32
    %9 = vector.broadcast %cst_2 : f32 to vector<8x128xf32>
    %10 = arith.cmpf oeq, %4, %9 : vector<8x128xf32>
    %11 = arith.extui %10 : vector<8x128xi1> to vector<8x128xi32>
    %12 = arith.sitofp %11 : vector<8x128xi32> to vector<8x128xf32>
    %c4_3 = arith.constant 4 : index
    %c0_4 = arith.constant 0 : index
    %c0_5 = arith.constant 0 : index
    %13 = vector.load %arg1[%c4_3, %c0_4, %c0_5] : memref<30x8x128xf32, #tpu.memory_space<vmem>>, vector<1x8x128xf32>
    %14 = vector.shape_cast %13 : vector<1x8x128xf32> to vector<8x128xf32>
    %15 = arith.subf %14, %4 : vector<8x128xf32>
    %c9 = arith.constant 9 : index
    %c0_6 = arith.constant 0 : index
    %c0_7 = arith.constant 0 : index
    %16 = vector.load %arg1[%c9, %c0_6, %c0_7] : memref<30x8x128xf32, #tpu.memory_space<vmem>>, vector<1x8x128xf32>
    %17 = vector.shape_cast %16 : vector<1x8x128xf32> to vector<8x128xf32>
    %c9_8 = arith.constant 9 : index
    %c0_9 = arith.constant 0 : index
    %c0_10 = arith.constant 0 : index
    %18 = vector.load %arg2[%c9_8, %c0_9, %c0_10] : memref<30x8x128xf32, #tpu.memory_space<vmem>>, vector<1x8x128xf32>
    %19 = vector.shape_cast %18 : vector<1x8x128xf32> to vector<8x128xf32>
    %20 = arith.subf %17, %19 : vector<8x128xf32>
    %21 = arith.mulf %15, %15 : vector<8x128xf32>
    %22 = arith.mulf %20, %20 : vector<8x128xf32>
    %23 = arith.addf %21, %22 : vector<8x128xf32>
    %c10 = arith.constant 10 : index
    %c0_11 = arith.constant 0 : index
    %c0_12 = arith.constant 0 : index
    %24 = vector.load %arg1[%c10, %c0_11, %c0_12] : memref<30x8x128xf32, #tpu.memory_space<vmem>>, vector<20x8x128xf32>
    %c10_13 = arith.constant 10 : index
    %c0_14 = arith.constant 0 : index
    %c0_15 = arith.constant 0 : index
    %25 = vector.load %arg2[%c10_13, %c0_14, %c0_15] : memref<30x8x128xf32, #tpu.memory_space<vmem>>, vector<20x8x128xf32>
    %26 = arith.subf %24, %25 : vector<20x8x128xf32>
    %27 = arith.mulf %26, %26 : vector<20x8x128xf32>
    %cst_16 = arith.constant dense<0.000000e+00> : vector<8x128xf32>
    %28 = vector.multi_reduction <add>, %27, %cst_16 [0] : vector<20x8x128xf32> to vector<8x128xf32>
    %c0_17 = arith.constant 0 : index
    %c0_18 = arith.constant 0 : index
    %c0_19 = arith.constant 0 : index
    %29 = vector.load %arg2[%c0_17, %c0_18, %c0_19] : memref<30x8x128xf32, #tpu.memory_space<vmem>>, vector<5x8x128xf32>
    %30 = vector.extract_strided_slice %29 {offsets = [0, 0, 0], sizes = [1, 8, 128], strides = [1, 1, 1]} : vector<5x8x128xf32> to vector<1x8x128xf32>
    %31 = vector.shape_cast %30 : vector<1x8x128xf32> to vector<8x128xf32>
    %cst_20 = arith.constant 0.0714285746 : f32
    %32 = vector.broadcast %cst_20 : f32 to vector<8x128xf32>
    %33 = arith.mulf %31, %32 : vector<8x128xf32>
    %34 = vector.extract_strided_slice %29 {offsets = [1, 0, 0], sizes = [1, 8, 128], strides = [1, 1, 1]} : vector<5x8x128xf32> to vector<1x8x128xf32>
    %35 = vector.shape_cast %34 : vector<1x8x128xf32> to vector<8x128xf32>
    %cst_21 = arith.constant 0.0714285746 : f32
    %36 = vector.broadcast %cst_21 : f32 to vector<8x128xf32>
    %37 = arith.mulf %35, %36 : vector<8x128xf32>
    %38 = vector.extract_strided_slice %29 {offsets = [2, 0, 0], sizes = [1, 8, 128], strides = [1, 1, 1]} : vector<5x8x128xf32> to vector<1x8x128xf32>
    %39 = vector.shape_cast %38 : vector<1x8x128xf32> to vector<8x128xf32>
    %cst_22 = arith.constant 5.000000e-01 : f32
    %40 = vector.broadcast %cst_22 : f32 to vector<8x128xf32>
    %41 = arith.mulf %40, %39 : vector<8x128xf32>
    %42 = vector.extract_strided_slice %29 {offsets = [3, 0, 0], sizes = [1, 8, 128], strides = [1, 1, 1]} : vector<5x8x128xf32> to vector<1x8x128xf32>
    %43 = vector.shape_cast %42 : vector<1x8x128xf32> to vector<8x128xf32>
    %cst_23 = arith.constant 5.000000e-01 : f32
    %44 = vector.broadcast %cst_23 : f32 to vector<8x128xf32>
    %45 = arith.mulf %44, %43 : vector<8x128xf32>
    %46 = arith.subf %33, %41 : vector<8x128xf32>
    %47 = arith.subf %37, %45 : vector<8x128xf32>
    %48 = arith.addf %33, %41 : vector<8x128xf32>
    %49 = arith.addf %37, %45 : vector<8x128xf32>
    %50 = arith.subf %48, %46 : vector<8x128xf32>
    %51 = arith.subf %49, %47 : vector<8x128xf32>
    %52 = arith.mulf %50, %51 : vector<8x128xf32>
    %c0_24 = arith.constant 0 : index
    %c0_25 = arith.constant 0 : index
    %c0_26 = arith.constant 0 : index
    %53 = vector.load %arg1[%c0_24, %c0_25, %c0_26] : memref<30x8x128xf32, #tpu.memory_space<vmem>>, vector<5x8x128xf32>
    %54 = vector.extract_strided_slice %53 {offsets = [0, 0, 0], sizes = [1, 8, 128], strides = [1, 1, 1]} : vector<5x8x128xf32> to vector<1x8x128xf32>
    %55 = vector.shape_cast %54 : vector<1x8x128xf32> to vector<8x128xf32>
    %cst_27 = arith.constant 0.0714285746 : f32
    %56 = vector.broadcast %cst_27 : f32 to vector<8x128xf32>
    %57 = arith.mulf %55, %56 : vector<8x128xf32>
    %58 = vector.extract_strided_slice %53 {offsets = [1, 0, 0], sizes = [1, 8, 128], strides = [1, 1, 1]} : vector<5x8x128xf32> to vector<1x8x128xf32>
    %59 = vector.shape_cast %58 : vector<1x8x128xf32> to vector<8x128xf32>
    %cst_28 = arith.constant 0.0714285746 : f32
    %60 = vector.broadcast %cst_28 : f32 to vector<8x128xf32>
    %61 = arith.mulf %59, %60 : vector<8x128xf32>
    %62 = vector.extract_strided_slice %53 {offsets = [2, 0, 0], sizes = [1, 8, 128], strides = [1, 1, 1]} : vector<5x8x128xf32> to vector<1x8x128xf32>
    %63 = vector.shape_cast %62 : vector<1x8x128xf32> to vector<8x128xf32>
    %cst_29 = arith.constant 5.000000e-01 : f32
    %64 = vector.broadcast %cst_29 : f32 to vector<8x128xf32>
    %65 = arith.mulf %64, %63 : vector<8x128xf32>
    %66 = vector.extract_strided_slice %53 {offsets = [3, 0, 0], sizes = [1, 8, 128], strides = [1, 1, 1]} : vector<5x8x128xf32> to vector<1x8x128xf32>
    %67 = vector.shape_cast %66 : vector<1x8x128xf32> to vector<8x128xf32>
    %cst_30 = arith.constant 5.000000e-01 : f32
    %68 = vector.broadcast %cst_30 : f32 to vector<8x128xf32>
    %69 = arith.mulf %68, %67 : vector<8x128xf32>
    %70 = arith.subf %57, %65 : vector<8x128xf32>
    %71 = arith.subf %61, %69 : vector<8x128xf32>
    %72 = arith.addf %57, %65 : vector<8x128xf32>
    %73 = arith.addf %61, %69 : vector<8x128xf32>
    %74 = arith.minimumf %72, %48 : vector<8x128xf32>
    %75 = arith.maximumf %70, %46 : vector<8x128xf32>
    %76 = arith.subf %74, %75 : vector<8x128xf32>
    %cst_31 = arith.constant 0.000000e+00 : f32
    %77 = vector.broadcast %cst_31 : f32 to vector<8x128xf32>
    %78 = arith.maximumf %76, %77 : vector<8x128xf32>
    %79 = arith.minimumf %73, %49 : vector<8x128xf32>
    %80 = arith.maximumf %71, %47 : vector<8x128xf32>
    %81 = arith.subf %79, %80 : vector<8x128xf32>
    %cst_32 = arith.constant 0.000000e+00 : f32
    %82 = vector.broadcast %cst_32 : f32 to vector<8x128xf32>
    %83 = arith.maximumf %81, %82 : vector<8x128xf32>
    %84 = arith.mulf %78, %83 : vector<8x128xf32>
    %85 = arith.subf %72, %70 : vector<8x128xf32>
    %86 = arith.subf %73, %71 : vector<8x128xf32>
    %87 = arith.mulf %85, %86 : vector<8x128xf32>
    %88 = arith.addf %87, %52 : vector<8x128xf32>
    %89 = arith.subf %88, %84 : vector<8x128xf32>
    %cst_33 = arith.constant 0.000000e+00 : f32
    %90 = vector.broadcast %cst_33 : f32 to vector<8x128xf32>
    %91 = arith.cmpf ogt, %89, %90 : vector<8x128xf32>
    %cst_34 = arith.constant 1.000000e+00 : f32
    %92 = vector.broadcast %cst_34 : f32 to vector<8x128xf32>
    %93 = arith.select %91, %89, %92 : vector<8x128xi1>, vector<8x128xf32>
    %94 = arith.divf %84, %93 : vector<8x128xf32>
    %c5 = arith.constant 5 : index
    %c0_35 = arith.constant 0 : index
    %c0_36 = arith.constant 0 : index
    %95 = vector.load %arg1[%c5, %c0_35, %c0_36] : memref<30x8x128xf32, #tpu.memory_space<vmem>>, vector<5x8x128xf32>
    %96 = vector.extract_strided_slice %95 {offsets = [0, 0, 0], sizes = [1, 8, 128], strides = [1, 1, 1]} : vector<5x8x128xf32> to vector<1x8x128xf32>
    %97 = vector.shape_cast %96 : vector<1x8x128xf32> to vector<8x128xf32>
    %cst_37 = arith.constant 0.0714285746 : f32
    %98 = vector.broadcast %cst_37 : f32 to vector<8x128xf32>
    %99 = arith.mulf %97, %98 : vector<8x128xf32>
    %100 = vector.extract_strided_slice %95 {offsets = [1, 0, 0], sizes = [1, 8, 128], strides = [1, 1, 1]} : vector<5x8x128xf32> to vector<1x8x128xf32>
    %101 = vector.shape_cast %100 : vector<1x8x128xf32> to vector<8x128xf32>
    %cst_38 = arith.constant 0.0714285746 : f32
    %102 = vector.broadcast %cst_38 : f32 to vector<8x128xf32>
    %103 = arith.mulf %101, %102 : vector<8x128xf32>
    %104 = vector.extract_strided_slice %95 {offsets = [2, 0, 0], sizes = [1, 8, 128], strides = [1, 1, 1]} : vector<5x8x128xf32> to vector<1x8x128xf32>
    %105 = vector.shape_cast %104 : vector<1x8x128xf32> to vector<8x128xf32>
    %cst_39 = arith.constant 5.000000e-01 : f32
    %106 = vector.broadcast %cst_39 : f32 to vector<8x128xf32>
    %107 = arith.mulf %106, %105 : vector<8x128xf32>
    %108 = vector.extract_strided_slice %95 {offsets = [3, 0, 0], sizes = [1, 8, 128], strides = [1, 1, 1]} : vector<5x8x128xf32> to vector<1x8x128xf32>
    %109 = vector.shape_cast %108 : vector<1x8x128xf32> to vector<8x128xf32>
    %cst_40 = arith.constant 5.000000e-01 : f32
    %110 = vector.broadcast %cst_40 : f32 to vector<8x128xf32>
    %111 = arith.mulf %110, %109 : vector<8x128xf32>
    %112 = arith.subf %99, %107 : vector<8x128xf32>
    %113 = arith.subf %103, %111 : vector<8x128xf32>
    %114 = arith.addf %99, %107 : vector<8x128xf32>
    %115 = arith.addf %103, %111 : vector<8x128xf32>
    %116 = arith.minimumf %114, %48 : vector<8x128xf32>
    %117 = arith.maximumf %112, %46 : vector<8x128xf32>
    %118 = arith.subf %116, %117 : vector<8x128xf32>
    %cst_41 = arith.constant 0.000000e+00 : f32
    %119 = vector.broadcast %cst_41 : f32 to vector<8x128xf32>
    %120 = arith.maximumf %118, %119 : vector<8x128xf32>
    %121 = arith.minimumf %115, %49 : vector<8x128xf32>
    %122 = arith.maximumf %113, %47 : vector<8x128xf32>
    %123 = arith.subf %121, %122 : vector<8x128xf32>
    %cst_42 = arith.constant 0.000000e+00 : f32
    %124 = vector.broadcast %cst_42 : f32 to vector<8x128xf32>
    %125 = arith.maximumf %123, %124 : vector<8x128xf32>
    %126 = arith.mulf %120, %125 : vector<8x128xf32>
    %127 = arith.subf %114, %112 : vector<8x128xf32>
    %128 = arith.subf %115, %113 : vector<8x128xf32>
    %129 = arith.mulf %127, %128 : vector<8x128xf32>
    %130 = arith.addf %129, %52 : vector<8x128xf32>
    %131 = arith.subf %130, %126 : vector<8x128xf32>
    %cst_43 = arith.constant 0.000000e+00 : f32
    %132 = vector.broadcast %cst_43 : f32 to vector<8x128xf32>
    %133 = arith.cmpf ogt, %131, %132 : vector<8x128xf32>
    %cst_44 = arith.constant 1.000000e+00 : f32
    %134 = vector.broadcast %cst_44 : f32 to vector<8x128xf32>
    %135 = arith.select %133, %131, %134 : vector<8x128xi1>, vector<8x128xf32>
    %136 = arith.divf %126, %135 : vector<8x128xf32>
    %137 = arith.cmpf ogt, %136, %94 : vector<8x128xf32>
    %138 = arith.select %137, %136, %94 : vector<8x128xi1>, vector<8x128xf32>
    %c9_45 = arith.constant 9 : index
    %c0_46 = arith.constant 0 : index
    %c0_47 = arith.constant 0 : index
    %139 = vector.load %arg1[%c9_45, %c0_46, %c0_47] : memref<30x8x128xf32, #tpu.memory_space<vmem>>, vector<1x8x128xf32>
    %140 = vector.shape_cast %139 : vector<1x8x128xf32> to vector<8x128xf32>
    %c4_48 = arith.constant 4 : index
    %c0_49 = arith.constant 0 : index
    %c0_50 = arith.constant 0 : index
    %141 = vector.load %arg1[%c4_48, %c0_49, %c0_50] : memref<30x8x128xf32, #tpu.memory_space<vmem>>, vector<1x8x128xf32>
    %142 = vector.shape_cast %141 : vector<1x8x128xf32> to vector<8x128xf32>
    %143 = arith.select %137, %140, %142 : vector<8x128xi1>, vector<8x128xf32>
    %144 = arith.subf %143, %138 : vector<8x128xf32>
    %145 = arith.mulf %144, %144 : vector<8x128xf32>
    %146 = vector.shape_cast %137 : vector<8x128xi1> to vector<1x8x128xi1>
    %147 = vector.broadcast %146 : vector<1x8x128xi1> to vector<2x8x128xi1>
    %c5_51 = arith.constant 5 : index
    %c0_52 = arith.constant 0 : index
    %c0_53 = arith.constant 0 : index
    %148 = vector.load %arg1[%c5_51, %c0_52, %c0_53] : memref<30x8x128xf32, #tpu.memory_space<vmem>>, vector<2x8x128xf32>
    %c0_54 = arith.constant 0 : index
    %c0_55 = arith.constant 0 : index
    %c0_56 = arith.constant 0 : index
    %149 = vector.load %arg1[%c0_54, %c0_55, %c0_56] : memref<30x8x128xf32, #tpu.memory_space<vmem>>, vector<2x8x128xf32>
    %150 = arith.select %147, %148, %149 : vector<2x8x128xi1>, vector<2x8x128xf32>
    %c5_57 = arith.constant 5 : index
    %c0_58 = arith.constant 0 : index
    %c0_59 = arith.constant 0 : index
    %151 = vector.load %arg2[%c5_57, %c0_58, %c0_59] : memref<30x8x128xf32, #tpu.memory_space<vmem>>, vector<2x8x128xf32>
    %c0_60 = arith.constant 0 : index
    %c0_61 = arith.constant 0 : index
    %c0_62 = arith.constant 0 : index
    %152 = vector.load %arg2[%c0_60, %c0_61, %c0_62] : memref<30x8x128xf32, #tpu.memory_space<vmem>>, vector<2x8x128xf32>
    %153 = arith.select %147, %151, %152 : vector<2x8x128xi1>, vector<2x8x128xf32>
    %154 = arith.subf %150, %153 : vector<2x8x128xf32>
    %155 = arith.mulf %154, %154 : vector<2x8x128xf32>
    %cst_63 = arith.constant dense<0.000000e+00> : vector<8x128xf32>
    %156 = vector.multi_reduction <add>, %155, %cst_63 [0] : vector<2x8x128xf32> to vector<8x128xf32>
    %157 = vector.shape_cast %6 : vector<8x128xi1> to vector<1x8x128xi1>
    %158 = vector.broadcast %157 : vector<1x8x128xi1> to vector<2x8x128xi1>
    %c7 = arith.constant 7 : index
    %c0_64 = arith.constant 0 : index
    %c0_65 = arith.constant 0 : index
    %159 = vector.load %arg1[%c7, %c0_64, %c0_65] : memref<30x8x128xf32, #tpu.memory_space<vmem>>, vector<2x8x128xf32>
    %c2 = arith.constant 2 : index
    %c0_66 = arith.constant 0 : index
    %c0_67 = arith.constant 0 : index
    %160 = vector.load %arg1[%c2, %c0_66, %c0_67] : memref<30x8x128xf32, #tpu.memory_space<vmem>>, vector<2x8x128xf32>
    %161 = arith.select %147, %159, %160 : vector<2x8x128xi1>, vector<2x8x128xf32>
    %cst_68 = arith.constant 1.000000e+00 : f32
    %162 = vector.broadcast %cst_68 : f32 to vector<2x8x128xf32>
    %163 = arith.select %158, %161, %162 : vector<2x8x128xi1>, vector<2x8x128xf32>
    %c7_69 = arith.constant 7 : index
    %c0_70 = arith.constant 0 : index
    %c0_71 = arith.constant 0 : index
    %164 = vector.load %arg2[%c7_69, %c0_70, %c0_71] : memref<30x8x128xf32, #tpu.memory_space<vmem>>, vector<2x8x128xf32>
    %c2_72 = arith.constant 2 : index
    %c0_73 = arith.constant 0 : index
    %c0_74 = arith.constant 0 : index
    %165 = vector.load %arg2[%c2_72, %c0_73, %c0_74] : memref<30x8x128xf32, #tpu.memory_space<vmem>>, vector<2x8x128xf32>
    %166 = arith.select %147, %164, %165 : vector<2x8x128xi1>, vector<2x8x128xf32>
    %cst_75 = arith.constant 1.000000e+00 : f32
    %167 = vector.broadcast %cst_75 : f32 to vector<2x8x128xf32>
    %168 = arith.select %158, %166, %167 : vector<2x8x128xi1>, vector<2x8x128xf32>
    %169 = math.sqrt %163 : vector<2x8x128xf32>
    %170 = math.sqrt %168 : vector<2x8x128xf32>
    %171 = arith.subf %169, %170 : vector<2x8x128xf32>
    %172 = arith.mulf %171, %171 : vector<2x8x128xf32>
    %cst_76 = arith.constant dense<0.000000e+00> : vector<8x128xf32>
    %173 = vector.multi_reduction <add>, %172, %cst_76 [0] : vector<2x8x128xf32> to vector<8x128xf32>
    %174 = arith.mulf %12, %23 : vector<8x128xf32>
    %cst_77 = arith.constant 5.000000e-01 : f32
    %175 = vector.broadcast %cst_77 : f32 to vector<8x128xf32>
    %176 = arith.mulf %175, %174 : vector<8x128xf32>
    %177 = arith.addf %28, %145 : vector<8x128xf32>
    %178 = arith.addf %156, %173 : vector<8x128xf32>
    %cst_78 = arith.constant 5.000000e+00 : f32
    %179 = vector.broadcast %cst_78 : f32 to vector<8x128xf32>
    %180 = arith.mulf %179, %178 : vector<8x128xf32>
    %181 = arith.addf %177, %180 : vector<8x128xf32>
    %182 = arith.mulf %8, %181 : vector<8x128xf32>
    %183 = arith.addf %176, %182 : vector<8x128xf32>
    %c0_79 = arith.constant 0 : index
    %c0_80 = arith.constant 0 : index
    %184 = vector.load %arg4[%c0_79, %c0_80] : memref<8x128xf32, #tpu.memory_space<vmem>>, vector<8x128xf32>
    %185 = arith.addf %184, %183 : vector<8x128xf32>
    %c0_81 = arith.constant 0 : index
    %c0_82 = arith.constant 0 : index
    %186 = vector.load %arg4[%c0_81, %c0_82] : memref<8x128xf32, #tpu.memory_space<vmem>>, vector<8x128xf32>
    tpu.vector_store %arg4[%c0_81, %c0_82], %185 {strides = array<i32>} : memref<8x128xf32, #tpu.memory_space<vmem>>, vector<8x128xf32>,
    %c0_i32_83 = arith.constant 0 : i32
    %187 = arith.cmpi eq, %arg0, %c0_i32_83 : i32
    %188 = arith.extui %187 : i1 to i32
    %c0_i32_84 = arith.constant 0 : i32
    %189 = arith.cmpi ne, %188, %c0_i32_84 : i32
    scf.if %189 {
      %c0_85 = arith.constant 0 : index
      %c0_86 = arith.constant 0 : index
      %190 = vector.load %arg4[%c0_85, %c0_86] : memref<8x128xf32, #tpu.memory_space<vmem>>, vector<8x128xf32>
      %191 = vector.shape_cast %190 : vector<8x128xf32> to vector<1x8x128xf32>
      %cst_87 = arith.constant dense<0.000000e+00> : vector<1xf32>
      %192 = vector.multi_reduction <add>, %191, %cst_87 [1, 2] : vector<1x8x128xf32> to vector<1xf32>
      %193 = vector.shape_cast %192 : vector<1xf32> to vector<1x1x1xf32>
      %194 = vector.extract %193[0, 0, 0] : f32 from vector<1x1x1xf32>
      %195 = vector.broadcast %194 : f32 to vector<8x128xf32>
      %c0_88 = arith.constant 0 : index
      %c0_89 = arith.constant 0 : index
      %196 = vector.load %arg3[%c0_88, %c0_89] : memref<8x128xf32, #tpu.memory_space<vmem>>, vector<8x128xf32>
      tpu.vector_store %arg3[%c0_88, %c0_89], %195 {strides = array<i32>} : memref<8x128xf32, #tpu.memory_space<vmem>>, vector<8x128xf32>,
    } else {
    }
    return
  }
  func.func @transform_0(%arg0: i32) -> (i32, i32, i32) {
    %c0_i32 = arith.constant 0 : i32
    %c0_i32_0 = arith.constant 0 : i32
    %c0_i32_1 = arith.constant 0 : i32
    return %c0_i32, %arg0, %c0_i32_0 : i32, i32, i32
  }
  func.func @transform_1(%arg0: i32) -> (i32, i32, i32) {
    %c0_i32 = arith.constant 0 : i32
    %c0_i32_0 = arith.constant 0 : i32
    %c0_i32_1 = arith.constant 0 : i32
    return %c0_i32, %arg0, %c0_i32_0 : i32, i32, i32
  }
  func.func @transform_2(%arg0: i32) -> (i32, i32) {
    %c0_i32 = arith.constant 0 : i32
    %c0_i32_0 = arith.constant 0 : i32
    %c0_i32_1 = arith.constant 0 : i32
    return %c0_i32, %c0_i32_0 : i32, i32
  }
}

</mosaic_0001>

<bundles_post_ra>
// kernel: tpu_custom_call.1
= control target key start
LH: loop header
LB: loop body
LE: loop exit
PB: predicated region body
PF: predicated region fallthrough
CT: control target
= control target key end

     0   :  { %7 = vsyncpa [#allocation4], 0  ;;  %s607_s0 = inlined_call_operand.hbm [shape: f32[30,8,128], index: 0, kind: input, shape index: {}]   ;;  %s608_s1 = inlined_call_operand.hbm [shape: f32[30,8,128], index: 1, kind: input, shape index: {}]   ;;  %s609_s2 = inlined_call_operand.hbm [shape: f32[8,128], index: 2, kind: output, shape index: {}]  }
   0x1   :  { %8 = vsyncpa [#allocation7], 0 }
   0x2   :  { %9 = vsyncpa [#allocation5], 0  ;;  %s444_s9 = smov [#allocation3]  }
   0x3   :  { %s15_s10 = sshll.u32 %s444_s9, 4  ;;  %s16_s10 = int_to_ptr.vmem [resolvable:$true] %s15_s10 }
   0x4   :  { %s386_s11 = scalar_lea.vmem %s16_s10, 3840  ;;  %p391_p1 = scmp.lt.s32.totalorder %s16_s10, %s16_s10 }
   0x5   :  { %p387_p0 = scmp.ne.s32.totalorder %s16_s10, %s386_s11  ;;  %p392_p2 = scmp.lt.s32.totalorder %s386_s11, %s386_s11 }
   0x7   :  { %p393_p3 = por %p392_p2, %p391_p1 }
   0x9   :  { %p394_p4 = pnand %p393_p3, %p387_p0 }
   0xb   :  { %397 = shalt.err (!%p394_p4)
}
   0xc   :  { %s445_s12 = smov 128   ;;  %s446_s13 = smov 8  }
   0xd   :  { %21 = dma.hbm_to_vmem [thread:$0]  %s607_s0, 3840, %s16_s10, [#allocation4], %s445_s12, %s445_s12, %s446_s13  }
   0xe   :  { %s447_s16 = smov [#allocation6]  }
   0xf   :  { %s27_s17 = sshll.u32 %s447_s16, 4  ;;  %s28_s17 = int_to_ptr.vmem [resolvable:$true] %s27_s17 }
  0x10   :  { %s406_s18 = scalar_lea.vmem %s28_s17, 3840  ;;  %p411_p6 = scmp.lt.s32.totalorder %s28_s17, %s28_s17 }
  0x11   :  { %p407_p5 = scmp.ne.s32.totalorder %s28_s17, %s406_s18  ;;  %p412_p7 = scmp.lt.s32.totalorder %s406_s18, %s406_s18 }
  0x13   :  { %p413_p8 = por %p412_p7, %p411_p6 }
  0x15   :  { %p414_p9 = pnand %p413_p8, %p407_p5 }
  0x17   :  { %417 = shalt.err (!%p414_p9)
}
  0x18   :  { %33 = dma.hbm_to_vmem [thread:$0]  %s608_s1, 3840, %s28_s17, [#allocation7], %s445_s12, %s445_s12, %s446_s13  }
  0x19   :  { %438 = dma.done.wait [#allocation4], 3840  }
  0x1a   :  { %439 = vsyncadd [#allocation4], 4294963456 }
  0x1b   :  { %440 = dma.done.wait [#allocation7], 3840  }
  0x1c   :  { %441 = vsyncadd [#allocation7], 4294963456  ;;  %v65_v0 = vld [vmem:[#allocation3 + $0x50] sm:$0xff]  ;;  %v66_v1 = vld [vmem:[#allocation3 + $0x58] sm:$0xff]  ;;  %s449_s0 = smov [#allocation8]  }
  0x1d   :  { %v86_v2 = vld [vmem:[#allocation6 + $0x50] sm:$0xff]  ;;  %v87_v3 = vld [vmem:[#allocation6 + $0x58] sm:$0xff]  ;;  %v88_v5 = vld [vmem:[#allocation6 + $0x60] sm:$0xff]  ;;  %s346_s1 = sshll.u32 %s449_s0, 4  ;;  %s347_s1 = int_to_ptr.vmem [resolvable:$true] %s346_s1 }
  0x1e   :  { %v67_v4 = vld [vmem:[#allocation3 + $0x60] sm:$0xff]  ;;  %v68_v6 = vld [vmem:[#allocation3 + $0x68] sm:$0xff]  ;;  %v69_v7 = vld [vmem:[#allocation3 + $0x70] sm:$0xff]  ;;  %v106_v9 = vsub.f32 %v65_v0, %v86_v2  ;;  %v107_v10 = vsub.f32 %v66_v1, %v87_v3  ;;  %s418_s22 = scalar_lea.vmem %s347_s1, 128  ;;  %p423_p11 = scmp.lt.s32.totalorder %s347_s1, %s347_s1 }
  0x1f   :  { %v89_v8 = vld [vmem:[#allocation6 + $0x68] sm:$0xff]  ;;  %v90_v12 = vld [vmem:[#allocation6 + $0x70] sm:$0xff]  ;;  %v91_v13 = vld [vmem:[#allocation6 + $0x78] sm:$0xff]  ;;  %v108_v14 = vsub.f32 %v67_v4, %v88_v5  ;;  %p419_p10 = scmp.ne.s32.totalorder %s347_s1, %s418_s22  ;;  %p424_p12 = scmp.lt.s32.totalorder %s418_s22, %s418_s22 }
  0x20   :  { %v70_v11 = vld [vmem:[#allocation3 + $0x78] sm:$0xff]  ;;  %v109_v15 = vsub.f32 %v68_v6, %v89_v8  ;;  %v71_v16 = vld [vmem:[#allocation3 + $0x80] sm:$0xff]  ;;  %v92_v17 = vld [vmem:[#allocation6 + $0x80] sm:$0xff]  ;;  %v110_v18 = vsub.f32 %v69_v7, %v90_v12  ;;  %v126_v20 = vmul.f32 %v106_v9, %v106_v9  ;;  %v127_v21 = vmul.f32 %v107_v10, %v107_v10 }
  0x21   :  { %v111_v19 = vsub.f32 %v70_v11, %v91_v13  ;;  %v471_v22 = vld [vmem:[#allocation6] sm:$0xff]  ;;  %v473_v23 = vld [vmem:[#allocation6 + $0x8] sm:$0xff]  ;;  %v128_v24 = vmul.f32 %v108_v14, %v108_v14  ;;  %v475_v25 = vld [vmem:[#allocation6 + $0x10] sm:$0xff]  ;;  %v112_v28 = vsub.f32 %v71_v16, %v92_v17  ;;  %p425_p13 = por %p424_p12, %p423_p11 }
  0x22   :  { %v477_v26 = vld [vmem:[#allocation6 + $0x18] sm:$0xff]  ;;  %v479_v27 = vld [vmem:[#allocation3] sm:$0xff]  ;;  %v129_v29 = vmul.f32 %v109_v15, %v109_v15  ;;  %v483_v31 = vld [vmem:[#allocation3 + $0x10] sm:$0xff]  ;;  %v130_v33 = vmul.f32 %v110_v18, %v110_v18  ;;  %v146_v35 = vadd.f32 %v127_v21, %v126_v20  ;;  %v169_v36 = vmul.f32 0.071428575, %v471_v22 }
  0x23   :  { %v481_v30 = vld [vmem:[#allocation3 + $0x8] sm:$0xff]  ;;  %v485_v32 = vld [vmem:[#allocation3 + $0x18] sm:$0xff]  ;;  %v131_v34 = vmul.f32 %v111_v19, %v111_v19  ;;  %v170_v37 = vmul.f32 0.071428575, %v473_v23  ;;  %v171_v38 = vmul.f32 0.5, %v475_v25  ;;  %v172_v39 = vmul.f32 0.5, %v477_v26  ;;  %p426_p0 = pnand %p425_p13, %p419_p10 }
  0x24   :  { %v184_v40 = vmul.f32 0.071428575, %v479_v27  ;;  %v147_v41 = vadd.f32 %v146_v35, %v128_v24  ;;  %v185_v42 = vmul.f32 0.071428575, %v481_v30  ;;  %v186_v43 = vmul.f32 0.5, %v483_v31  ;;  %v495_v45 = vld [vmem:[#allocation3 + $0x28] sm:$0xff] }
  0x25   :  { %v187_v44 = vmul.f32 0.5, %v485_v32  ;;  %v173_v46 = vsub.f32 %v169_v36, %v171_v38  ;;  %v174_v47 = vsub.f32 %v170_v37, %v172_v39  ;;  %v175_v48 = vadd.f32 %v171_v38, %v169_v36  ;;  %v72_v50 = vld [vmem:[#allocation3 + $0x88] sm:$0xff]  ;;  %v93_v55 = vld [vmem:[#allocation6 + $0x88] sm:$0xff]  ;;  %v497_v59 = vld [vmem:[#allocation3 + $0x30] sm:$0xff] }
  0x26   :  { %v176_v49 = vadd.f32 %v172_v39, %v170_v37  ;;  %v148_v51 = vadd.f32 %v147_v41, %v129_v29  ;;  %v188_v52 = vsub.f32 %v184_v40, %v186_v43  ;;  %v190_v54 = vadd.f32 %v186_v43, %v184_v40  ;;  %v499_v60 = vld [vmem:[#allocation3 + $0x38] sm:$0xff]  ;;  %v502_v2 = vld [vmem:[#allocation3 + $0x40] sm:$0xff]  ;;  %v73_v19 = vld [vmem:[#allocation3 + $0x90] sm:$0xff] }
  0x27   :  { %v189_v53 = vsub.f32 %v185_v42, %v187_v44  ;;  %v177_v56 = vsub.f32 %v175_v48, %v173_v46  ;;  %v191_v58 = vadd.f32 %v187_v44, %v185_v42  ;;  %v215_v61 = vmul.f32 0.071428575, %v495_v45  ;;  %v94_v20 = vld [vmem:[#allocation6 + $0x90] sm:$0xff] }
  0x28   :  { %v178_v57 = vsub.f32 %v176_v49, %v174_v47  ;;  %v149_v62 = vadd.f32 %v148_v51, %v130_v33  ;;  %v192_v63 = vmin.f32 %v190_v54, %v175_v48  ;;  %v193_v0 = vmax.f32 %v188_v52, %v173_v46 }
  0x29   :  { %v197_v1 = vmax.f32 %v189_v53, %v174_v47  ;;  %v196_v4 = vmin.f32 %v191_v58, %v176_v49  ;;  %v201_v5 = vsub.f32 %v190_v54, %v188_v52  ;;  %v202_v6 = vsub.f32 %v191_v58, %v189_v53  ;;  %v74_v52 = vld [vmem:[#allocation3 + $0x98] sm:$0xff]  ;;  %v95_v53 = vld [vmem:[#allocation6 + $0x98] sm:$0xff] }
  0x2a   :  { %v179_v3 = vmul.f32 %v178_v57, %v177_v56  ;;  %v113_v7 = vsub.f32 %v72_v50, %v93_v55  ;;  %v194_v8 = vsub.f32 %v192_v63, %v193_v0  ;;  %v216_v9 = vmul.f32 0.071428575, %v497_v59 }
  0x2b   :  { %v217_v10 = vmul.f32 0.5, %v499_v60  ;;  %v132_v11 = vmul.f32 %v112_v28, %v112_v28  ;;  %v198_v12 = vsub.f32 %v196_v4, %v197_v1  ;;  %v203_v13 = vmul.f32 %v202_v6, %v201_v5  ;;  %v76_v4 = vld [vmem:[#allocation3 + $0xa8] sm:$0xff]  ;;  %v97_v5 = vld [vmem:[#allocation6 + $0xa8] sm:$0xff] }
  0x2c   :  { %v218_v14 = vmul.f32 0.5, %v502_v2  ;;  %v150_v15 = vadd.f32 %v149_v62, %v131_v34  ;;  %v195_v16 = vmax.f32 %v194_v8, 0.0  ;;  %v114_v41 = vsub.f32 %v73_v19, %v94_v20  ;;  %v79_v20 = vld [vmem:[#allocation3 + $0xc0] sm:$0xff] }
  0x2d   :  { %v219_v17 = vsub.f32 %v215_v61, %v217_v10  ;;  %v221_v18 = vadd.f32 %v217_v10, %v215_v61  ;;  %v199_v21 = vmax.f32 %v198_v12, 0.0  ;;  %v204_v24 = vadd.f32 %v203_v13, %v179_v3  ;;  %v96_v61 = vld [vmem:[#allocation6 + $0xa0] sm:$0xff]  ;;  %v98_v10 = vld [vmem:[#allocation6 + $0xb0] sm:$0xff] }
  0x2e   :  { %v220_v29 = vsub.f32 %v216_v9, %v218_v14  ;;  %v222_v33 = vadd.f32 %v218_v14, %v216_v9  ;;  %v133_v42 = vmul.f32 %v113_v7, %v113_v7  ;;  %v151_v34 = vadd.f32 %v150_v15, %v132_v11  ;;  %v77_v9 = vld [vmem:[#allocation3 + $0xb0] sm:$0xff]  ;;  %v78_v14 = vld [vmem:[#allocation3 + $0xb8] sm:$0xff]  ;;  %v99_v15 = vld [vmem:[#allocation6 + $0xb8] sm:$0xff] }
  0x2f   :  { %v223_v35 = vmin.f32 %v221_v18, %v175_v48  ;;  %v224_v36 = vmax.f32 %v219_v17, %v173_v46  ;;  %v232_v37 = vsub.f32 %v221_v18, %v219_v17  ;;  %v200_v38 = vmul.f32 %v199_v21, %v195_v16  ;;  %v100_v21 = vld [vmem:[#allocation6 + $0xc0] sm:$0xff] }
  0x30   :  { %v227_v39 = vmin.f32 %v222_v33, %v176_v49  ;;  %v228_v28 = vmax.f32 %v220_v29, %v174_v47  ;;  %v233_v40 = vsub.f32 %v222_v33, %v220_v29  ;;  %v115_v46 = vsub.f32 %v74_v52, %v95_v53  ;;  %v75_v47 = vld [vmem:[#allocation3 + $0xa0] sm:$0xff]  ;;  %v509_v33 = vld [vmem:[#allocation6 + $0x20] sm:$0xff] }
  0x31   :  { %v225_v43 = vsub.f32 %v223_v35, %v224_v36  ;;  %v205_v44 = vsub.f32 %v204_v24, %v200_v38  ;;  %v134_v57 = vmul.f32 %v114_v41, %v114_v41  ;;  %v152_v58 = vadd.f32 %v151_v34, %v133_v42  ;;  %v273_v42 = vld [vmem:[#allocation6 + $0x40] sm:$0xff]  ;;  %v102_v34 = vld [vmem:[#allocation6 + $0xd0] sm:$0xff] }
  0x32   :  { %v229_v50 = vsub.f32 %v227_v39, %v228_v28  ;;  %v234_v51 = vmul.f32 %v233_v40, %v232_v37  ;;  %v116_v63 = vsub.f32 %v75_v47, %v96_v61  ;;  %v135_v0 = vmul.f32 %v115_v46, %v115_v46  ;;  %v80_v28 = vld [vmem:[#allocation3 + $0xc8] sm:$0xff]  ;;  %v101_v40 = vld [vmem:[#allocation6 + $0xc8] sm:$0xff]  ;;  %v83_v47 = vld [vmem:[#allocation3 + $0xe0] sm:$0xff] }
  0x33   :  { %v226_v54 = vmax.f32 %v225_v43, 0.0  ;;  %vm206_vm0 = vcmp.gt.f32.partialorder %v205_v44, 0.0  ;;  %v153_v1 = vadd.f32 %v152_v58, %v134_v57  ;;  %v117_v7 = vsub.f32 %v76_v4, %v97_v5  ;;  %v81_v43 = vld [vmem:[#allocation3 + $0xd0] sm:$0xff]  ;;  %v82_v57 = vld [vmem:[#allocation3 + $0xd8] sm:$0xff]  ;;  %v103_v58 = vld [vmem:[#allocation6 + $0xd8] sm:$0xff] }
  0x34   :  { %v230_v55 = vmax.f32 %v229_v50, 0.0  ;;  %v235_v56 = vadd.f32 %v234_v51, %v179_v3  ;;  %v207_v48 = vsel %vm206_vm0, %v205_v44, 1.0  ;;  %v136_v8 = vmul.f32 %v116_v63, %v116_v63  ;;  %v84_v61 = vld [vmem:[#allocation3 + $0xe8] sm:$0xff]  ;;  %v105_v63 = vld [vmem:[#allocation6 + $0xe8] sm:$0xff] }
  0x35   :  { %366 = vrcp.f32 %v207_v48  ;;  %v154_v3 = vadd.f32 %v153_v1, %v135_v0  ;;  %v118_v11 = vsub.f32 %v77_v9, %v98_v10  ;;  %v137_v12 = vmul.f32 %v117_v7, %v117_v7  ;;  %v251_v5 = vld [vmem:[#allocation6 + $0x28] sm:$0xff]  ;;  %v252_v9 = vld [vmem:[#allocation6 + $0x30] sm:$0xff] }
  0x36   :  { %v231_v49 = vmul.f32 %v230_v55, %v226_v54  ;;  %v119_v17 = vsub.f32 %v78_v14, %v99_v15  ;;  %v120_v35 = vsub.f32 %v79_v20, %v100_v21  ;;  %vm47_vm2 = vcmp.gt.f32.partialorder %v509_v33, 0.0 }
  0x37   :  { %v155_v13 = vadd.f32 %v154_v3, %v136_v8  ;;  %v138_v18 = vmul.f32 %v118_v11, %v118_v11  ;;  %v121_v44 = vsub.f32 %v80_v28, %v101_v40  ;;  %v123_v0 = vsub.f32 %v82_v57, %v103_v58 }
  0x38   :  { %v236_v62 = vsub.f32 %v235_v56, %v231_v49  ;;  %v139_v36 = vmul.f32 %v119_v17, %v119_v17  ;;  %v140_v50 = vmul.f32 %v120_v35, %v120_v35  ;;  %v125_v3 = vsub.f32 %v84_v61, %v105_v63 }
  0x39   :  { %v156_v19 = vadd.f32 %v155_v13, %v137_v12  ;;  %v143_v10 = vmul.f32 %v123_v0, %v123_v0  ;;  %vm50_vm12 = vcmp.eq.f32.partialorder %v509_v33, 0.0 }
  0x3a   :  { %vm237_vm1 = vcmp.gt.f32.partialorder %v236_v62, 0.0 }
  0x3b   :  { %v238_v6 = vsel %vm237_vm1, %v236_v62, 1.0  ;;  %v157_v37 = vadd.f32 %v156_v19, %v138_v18  ;;  %v104_v62 = vld [vmem:[#allocation6 + $0xe0] sm:$0xff]  ;;  %v145_v19 = vmul.f32 %v125_v3, %v125_v3 }
  0x3c   :  { %368 = vrcp.f32 %v238_v6  ;;  %v124_v8 = vsub.f32 %v83_v47, %v104_v62 }
  0x3d   :  { %v158_v51 = vadd.f32 %v157_v37, %v139_v36 }
  0x3e   :  { %v144_v18 = vmul.f32 %v124_v8, %v124_v8 }
  0x3f   :  { %v159_v48 = vadd.f32 %v158_v51, %v140_v50 }
  0x42   :  { %v367_v16 = vpop.eup %366 }
  0x43   :  { %v507_v24 = vmul.f32 %v367_v16, %v200_v38  ;;  %v272_v38 = vld [vmem:[#allocation6 + $0x38] sm:$0xff] }
  0x49   :  { %v369_v29 = vpop.eup %368 }
  0x4a   :  { %v511_v39 = vmul.f32 %v369_v29, %v231_v49  ;;  %v59_v49 = vld [vmem:[#allocation6 + $0x48] sm:$0xff] }
  0x4c   :  { %vm516_vm3 = vcmp.gt.f32.partialorder %v511_v39, %v507_v24 }
  0x4d   :  { %v267_v52 = vsel %vm516_vm3, %v499_v60, %v483_v31  ;;  %v268_v53 = vsel %vm516_vm3, %v502_v2, %v485_v32  ;;  %v277_v56 = vsel %vm516_vm3, %v272_v38, %v475_v25  ;;  %v278_v31 = vsel %vm516_vm3, %v273_v42, %v477_v26  ;;  %v54_v25 = vld [vmem:[#allocation3 + $0x20] sm:$0xff]  ;;  %v57_v26 = vld [vmem:[#allocation3 + $0x48] sm:$0xff] }
  0x4e   :  { %v530_v54 = vsel %vm47_vm2, %v267_v52, 1.0  ;;  %v534_v55 = vsel %vm47_vm2, %v268_v53, 1.0  ;;  %v122_v60 = vsub.f32 %v81_v43, %v102_v34  ;;  %v544_v32 = vsel %vm47_vm2, %v277_v56, 1.0 }
  0x4f   :  { %v141_v2 = vmul.f32 %v121_v44, %v121_v44  ;;  %v548_v46 = vsel %vm47_vm2, %v278_v31, 1.0  ;;  %370 = vrsqrt.f32 %v530_v54  ;;  %v55_v6 = vsub.f32 %v54_v25, %v509_v33 }
  0x50   :  { %372 = vrsqrt.f32 %v534_v55  ;;  %v142_v1 = vmul.f32 %v122_v60, %v122_v60  ;;  %v60_v7 = vsub.f32 %v57_v26, %v59_v49  ;;  %v248_v12 = vsel %vm516_vm3, %v495_v45, %v479_v27 }
  0x51   :  { %374 = vrsqrt.f32 %v544_v32  ;;  %v160_v4 = vadd.f32 %v159_v48, %v141_v2  ;;  %v253_v13 = vsel %vm516_vm3, %v251_v5, %v471_v22  ;;  %v249_v14 = vsel %vm516_vm3, %v497_v59, %v481_v30 }
  0x52   :  { %376 = vrsqrt.f32 %v548_v46  ;;  %v254_v15 = vsel %vm516_vm3, %v252_v9, %v473_v23  ;;  %v61_v16 = vmul.f32 %v55_v6, %v55_v6  ;;  %v62_v17 = vmul.f32 %v60_v7, %v60_v7 }
  0x53   :  { %v161_v11 = vadd.f32 %v160_v4, %v142_v1  ;;  %v242_v27 = vsel %vm516_vm3, %v511_v39, %v507_v24  ;;  %v243_v22 = vsel %vm516_vm3, %v57_v26, %v54_v25  ;;  %v255_v45 = vsub.f32 %v248_v12, %v253_v13 }
  0x54   :  { %v256_v30 = vsub.f32 %v249_v14, %v254_v15  ;;  %vm283_vm4 = vcmp.eq.f32.partialorder %v530_v54, inf  ;;  %vm285_vm5 = vcmp.eq.f32.partialorder %v530_v54, 0.0  ;;  %v286_v23 = vand.u32 2147483648, %v530_v54 }
  0x55   :  { %v162_v20 = vadd.f32 %v161_v11, %v143_v10  ;;  %vm290_vm6 = vcmp.eq.f32.partialorder %v534_v55, inf  ;;  %vm292_vm7 = vcmp.eq.f32.partialorder %v534_v55, 0.0  ;;  %v293_v24 = vand.u32 2147483648, %v534_v55 }
  0x56   :  { %vm297_vm8 = vcmp.eq.f32.partialorder %v544_v32, inf  ;;  %vm299_vm9 = vcmp.eq.f32.partialorder %v544_v32, 0.0  ;;  %v300_v37 = vand.u32 2147483648, %v544_v32  ;;  %vm304_vm10 = vcmp.eq.f32.partialorder %v548_v46, inf }
  0x57   :  { %v307_v41 = vand.u32 2147483648, %v548_v46  ;;  %vm306_vm11 = vcmp.eq.f32.partialorder %v548_v46, 0.0  ;;  %v163_v34 = vadd.f32 %v162_v20, %v144_v18  ;;  %v244_v44 = vsub.f32 %v243_v22, %v242_v27 }
  0x58   :  { %v257_v52 = vmul.f32 %v255_v45, %v255_v45  ;;  %v258_v53 = vmul.f32 %v256_v30, %v256_v30  ;;  %v63_v48 = vadd.f32 %v62_v17, %v61_v16  ;;  %v448_v49 = vmov 0.0  }
  0x59   :  { %v164_v58 = vadd.f32 %v163_v34, %v145_v19  ;;  %v245_v25 = vmul.f32 %v244_v44, %v244_v44  ;;  %v357_v47 = vsel %vm50_vm12, 1.0, %v448_v49 }
  0x5a   :  { %v314_v62 = vmul.f32 %v357_v47, %v63_v48 }
  0x5b   :  { %v316_v63 = vadd.f32 %v245_v25, %v164_v58 }
  0x5c   :  { %v371_v21 = vpop.eup %370  ;;  %v315_v1 = vmul.f32 0.5, %v314_v62 }
  0x5d   :  { %v373_v59 = vpop.eup %372  ;;  %v282_v29 = vmul.f32 %v371_v21, %v530_v54 }
  0x5e   :  { %v375_v35 = vpop.eup %374  ;;  %v289_v36 = vmul.f32 %v373_v59, %v534_v55 }
  0x5f   :  { %v377_v39 = vpop.eup %376  ;;  %v284_v28 = vsel %vm283_vm4, %v530_v54, %v282_v29  ;;  %v296_v40 = vmul.f32 %v375_v35, %v544_v32 }
  0x60   :  { %v287_v38 = vsel %vm285_vm5, %v286_v23, %v284_v28  ;;  %v291_v42 = vsel %vm290_vm6, %v534_v55, %v289_v36  ;;  %v303_v43 = vmul.f32 %v377_v39, %v548_v46  ;;  %v259_v55 = vadd.f32 %v258_v53, %v257_v52 }
  0x61   :  { %v294_v50 = vsel %vm292_vm7, %v293_v24, %v291_v42  ;;  %v298_v51 = vsel %vm297_vm8, %v544_v32, %v296_v40 }
  0x62   :  { %v301_v56 = vsel %vm299_vm9, %v300_v37, %v298_v51  ;;  %v305_v54 = vsel %vm304_vm10, %v548_v46, %v303_v43  ;;  %v356_v46 = vsel %vm47_vm2, 1.0, %v448_v49 }
  0x63   :  { %v308_v31 = vsel %vm306_vm11, %v307_v41, %v305_v54  ;;  %v309_v60 = vsub.f32 %v287_v38, %v301_v56 }
  0x64   :  { %v310_v2 = vsub.f32 %v294_v50, %v308_v31 }
  0x65   :  { %v311_v57 = vmul.f32 %v309_v60, %v309_v60 }
  0x66   :  { %v312_v26 = vmul.f32 %v310_v2, %v310_v2 }
  0x68   :  { %v313_v61 = vadd.f32 %v312_v26, %v311_v57 }
  0x6a   :  { %v317_v32 = vadd.f32 %v313_v61, %v259_v55 }
  0x6c   :  { %v318_v0 = vmul.f32 5.0, %v317_v32 }
  0x6e   :  { %v319_v4 = vadd.f32 %v318_v0, %v316_v63 }
  0x70   :  { %v320_v5 = vmul.f32 %v356_v46, %v319_v4 }
  0x72   :  { %v321_v6 = vadd.f32 %v320_v5, %v315_v1 }
  0x74   :  { %329 = vadd.xlane.f32.xlu0 %v321_v6 }
  0xfd   :  { %v330_v7 = vpop.xlane.xlu0 %329 }
  0xfe   :  { %v331_v8 = vrot.slane %v330_v7, 4 }
 0x100   :  { %v332_v3 = vadd.f32 %v331_v8, %v330_v7 }
 0x102   :  { %v333_v9 = vrot.slane %v332_v3, 2 }
 0x104   :  { %v334_v10 = vadd.f32 %v333_v9, %v332_v3 }
 0x106   :  { %v335_v11 = vrot.slane %v334_v10, 1 }
 0x108   :  { %v336_v12 = vadd.f32 %v335_v11, %v334_v10 }
 0x10a   :  { %358 = vpush %v336_v12 }
 0x13b   :  { %s359_s21 = spop %358 }
 0x13c   :  { %v338_v13 = vstv %s359_s21 }
 0x13d   :  { %339 = vst [vmem:[#allocation8] sm:$0xff] %v338_v13 }
 0x13e   :  { %429 = shalt.err (!%p426_p0)
}
 0x13f   :  { %349 = dma.vmem_to_hbm [thread:$0]  %s347_s1, 128, %s609_s2, [#allocation5]  }
 0x140   :  { %442 = dma.done.wait [#allocation5], 128  }
 0x141   :  { %443 = vsyncadd [#allocation5], 4294967168 }
 0x142   :  { %353 = vsyncpa [#allocation4], 1 }
 0x143   :  { %354 = vsyncpa [#allocation7], 1 }
 0x144   :  { %355 = vsyncpa [#allocation5], 1 }

</bundles_post_ra>
